<compile_context>
chip_gen: v5e
topology: v5e:2x2
jax: 0.10.0
libtpu: 0.0.40
codegen_flags: <defaults>
</compile_context>

<pallas_src>
import functools

import jax
import jax.numpy as jnp
from jax import lax
from jax.experimental import pallas as pl
from jax.experimental.pallas import tpu as pltpu

_MIB = 1024 * 1024


def _round_up(n: int, m: int) -> int:
    return ((n + m - 1) // m) * m


def _cdiv(a: int, b: int) -> int:
    return -(-a // b)


def _vmem_cap_bytes() -> int:
    """Physical-VMEM-aware cap (v7x: 64 MiB/TC, v5e/v6e: 128 MiB), with headroom."""
    phys = 64 * _MIB  # conservative default (v7x per-TensorCore)
    try:
        phys = int(getattr(pltpu.get_tpu_info(), "vmem_capacity_bytes", phys))
    except Exception:
        pass
    if phys < 32 * _MIB:          # sanity clamp against odd/unknown reports
        phys = 64 * _MIB
    return min(100 * _MIB, (phys * 3) // 4)


def _choose_tiling(rows: int, k_eff: int, itemsize: int, budget_bytes: int):
    """Largest batch tile whose double-buffered x slab fits `budget_bytes`.

    Accounts for lane padding (VMEM minor dim pads to 128 lanes), never rounds
    the tile up past the budget, and guarantees >= 2 tiles for rows >= 16 so the
    "parallel" batch axis load-balances across v7x's two TensorCores.
    """
    k_lanes = _round_up(k_eff, 128)
    tm = budget_bytes // (2 * k_lanes * itemsize)     # double-buffered x slab
    tm = max(8, (tm // 8) * 8)                        # sublane multiple, floored
    if tm >= 128:
        tm = (tm // 128) * 128                        # lane multiple, floored (<= budget)
    if rows >= 16:                                    # keep both v7x TCs busy
        tm = min(tm, max(8, _round_up(_cdiv(rows, 2), 8)))
    if tm >= rows:
        return rows, 1                                # single full-extent tile
    return tm, _cdiv(rows, tm)


def _vmem_block_bytes(sublanes: int, lanes: int, itemsize: int) -> int:
    return _round_up(max(sublanes, 1), 8) * _round_up(max(lanes, 1), 128) * itemsize


def _linear_policy_kernel(x_ref, w_ref, b_ref, o_ref):
    """One batch tile of y = x @ W_eff^T + b.

    x_ref: (TM, K)    VMEM, native input dtype (pipelined per grid step)
    w_ref: (P, K)     VMEM, lane-dense weight (resident across steps)
    b_ref: (1,)       SMEM, f32 scalar bias
    o_ref: (1, P, TM) VMEM, lane-dense output rows for this tile
    """
    # (P, K) · (TM, K) contracting K -> (P, TM): transposed-RHS MXU contraction,
    # native-dtype operands with f32 accumulate; result lands lane-dense.
    acc = lax.dot_general(
        w_ref[...], x_ref[...], (((1,), (1,)), ((), ())),
        preferred_element_type=jnp.float32)
    acc = acc + b_ref[0]                              # scalar bias from SMEM
    o_ref[...] = acc[None].astype(o_ref.dtype)


@functools.partial(jax.jit, static_argnames=("x_tile_budget_bytes",))
def linear_policy_forward(x, weight, bias, *, x_tile_budget_bytes=None):
    """x: (..., D); weight: (1, D); bias: (1,). Returns (..., 1) in x.dtype."""
    *lead, D = x.shape
    x2 = x.reshape(-1, D)                             # free (row-major) flatten
    B = x2.shape[0]
    out_dtype = x.dtype
    itemsize = jnp.dtype(x.dtype).itemsize
    out_itemsize = jnp.dtype(out_dtype).itemsize

    vmem_cap = _vmem_cap_bytes()
    if x_tile_budget_bytes is None:
        budget = max(2 * _MIB, (vmem_cap - 8 * _MIB) // 2)
    else:
        budget = int(min(x_tile_budget_bytes, max(2 * _MIB, vmem_cap - 8 * _MIB)))

    # Lane folding for narrow features: fold g rows into one lane-dense row and
    # contract against a block-diagonal (g, g*D) weight -> fully occupied vregs.
    g = 128 // D if 0 < D < 128 else 1
    if g >= 2 and B >= g and B % g == 0:
        rows, k_eff, p = B // g, g * D, g
        x_eff = x2.reshape(rows, k_eff)               # free (row-major) reshape
        w_eff = jnp.kron(jnp.eye(g, dtype=jnp.float32),
                         weight.reshape(1, D).astype(jnp.float32))
    else:
        rows, k_eff, p = B, D, 1
        x_eff = x2
        w_eff = weight.reshape(1, D).astype(jnp.float32)

    w_eff = w_eff.astype(x.dtype)                     # feed the MXU in native dtype
    b_smem = bias.astype(jnp.float32).reshape(1)      # (1,) SMEM scalar

    tm, num_tiles = _choose_tiling(rows, k_eff, itemsize, budget)

    # vmem_limit derived from the actual blocks (+ headroom), capped by chip VMEM.
    vmem_needed = (2 * _vmem_block_bytes(tm, k_eff, itemsize)      # x double buffer
                   + 2 * _vmem_block_bytes(p, k_eff, itemsize)     # weight
                   + 2 * _vmem_block_bytes(p, tm, out_itemsize))   # out double buffer
    vmem_limit = int(min(vmem_cap, max(16 * _MIB, vmem_needed + 8 * _MIB)))
    # TODO(synk): no K-axis (feature) tiling path -- a single (8, round_up(K,128))
    # block must fit VMEM, which holds for any realistic policy dim_x.

    cost = pl.CostEstimate(
        flops=2 * rows * p * k_eff,
        transcendentals=0,
        bytes_accessed=(rows * k_eff * itemsize                   # x read (single pass)
                        + p * k_eff * itemsize + 4                # weight + bias
                        + num_tiles * p * tm * out_itemsize),     # y write
    )

    out = pl.pallas_call(
        _linear_policy_kernel,
        out_shape=jax.ShapeDtypeStruct((num_tiles, p, tm), out_dtype),
        grid=(num_tiles,),
        in_specs=[
            pl.BlockSpec((tm, k_eff), lambda i: (i, 0)),           # x: pipelined tiles
            pl.BlockSpec((p, k_eff), lambda i: (0, 0)),            # weight: resident
            pl.BlockSpec(memory_space=pltpu.MemorySpace.SMEM),     # bias: SMEM scalar
        ],
        out_specs=pl.BlockSpec((1, p, tm), lambda i: (i, 0, 0)),   # lane-dense rows
        compiler_params=pltpu.CompilerParams(
            dimension_semantics=("parallel",),       # v7x: shard tiles over 2 TCs
            vmem_limit_bytes=vmem_limit,
        ),
        cost_estimate=cost,
    )(x_eff, w_eff, b_smem)

    # Garbage entries from the partial last tile land at flat index >= B and are
    # sliced off. The final (B, 1) column reshape is a tiny relayout (B elems),
    # kept only to match nn.Linear's output shape.
    if p == 1:
        y = out.reshape(-1)[:B]
    else:
        y = jnp.swapaxes(out, 1, 2).reshape(-1)[:B]   # [t,i,j] -> b = (t*tm+i)*g + j
    return y.reshape(*lead, 1)


if __name__ == "__main__":
    key = jax.random.PRNGKey(0)
    k_x, k_w, k_b, k_x2, k_x3, k_x4 = jax.random.split(key, 6)

    dim_x = 32
    bound = 1.0 / (dim_x ** 0.5)    # nn.Linear default init range
    weight = jax.random.uniform(k_w, (1, dim_x), jnp.float32, -bound, bound)
    bias = jax.random.uniform(k_b, (1,), jnp.float32, -bound, bound)

    def ref(xx):
        return xx.astype(jnp.float32) @ weight.T + bias

    # 1) Small batch, lane-folded path (D=32 -> g=4), single tile.
    x = jax.random.normal(k_x, (8, dim_x), jnp.float32)
    y = jax.block_until_ready(linear_policy_forward(x, weight, bias))
    assert y.shape == (8, 1)
    assert jnp.allclose(y, ref(x), atol=1e-5), "mismatch (folded, single tile)"

    # 2) Multi-tile folded path with a ragged last block (tiny tile budget).
    x2 = jax.random.normal(k_x2, (40, dim_x), jnp.float32)
    y2 = jax.block_until_ready(
        linear_policy_forward(x2, weight, bias, x_tile_budget_bytes=4096))
    assert y2.shape == (40, 1)
    assert jnp.allclose(y2, ref(x2), atol=1e-5), "mismatch (folded, multi tile)"

    # 3) Plain path (batch not divisible by the fold factor), ragged last block.
    x3 = jax.random.normal(k_x3, (30, dim_x), jnp.float32)
    y3 = jax.block_until_ready(
        linear_policy_forward(x3, weight, bias, x_tile_budget_bytes=4096))
    assert y3.shape == (30, 1)
    assert jnp.allclose(y3, ref(x3), atol=1e-5), "mismatch (plain, multi tile)"

    # 4) bf16 activations stream natively (weight cast to bf16, f32 accumulate).
    x4 = jax.random.normal(k_x4, (16, dim_x), jnp.bfloat16)
    y4 = jax.block_until_ready(linear_policy_forward(x4, weight, bias))
    y4_ref = (x4.astype(jnp.float32)
              @ weight.astype(jnp.bfloat16).astype(jnp.float32).T + bias)
    assert y4.dtype == jnp.bfloat16 and y4.shape == (16, 1)
    assert jnp.allclose(y4.astype(jnp.float32), y4_ref, atol=5e-2), "mismatch (bf16)"

    print("KERNEL_OK")
</pallas_src>

<mosaic_0001>
module attributes {stable_mosaic.version = 11 : i64} {
  func.func @_linear_policy_kernel(%arg0: i32, %arg1: memref<2x128xf32, #tpu.memory_space<vmem>>, %arg2: memref<4x128xf32, #tpu.memory_space<vmem>>, %arg3: memref<1xf32, #tpu.memory_space<smem>>, %arg4: memref<1x4x2xf32, #tpu.memory_space<vmem>>) attributes {dimension_semantics = [#tpu.dimension_semantics<parallel>], iteration_bounds = array<i64: 1>, scalar_prefetch = 0 : i64, scratch_operands = 0 : i64, tpu.core_type = #tpu.core_type<tc>, window_params = [{transform_indices = @transform_0, window_bounds = array<i64: 2, 128>}, {pipeline_mode = #tpu.pipeline_mode<synchronous>, transform_indices = @transform_1, window_bounds = array<i64: 4, 128>}, {transform_indices = @transform_2, window_bounds = array<i64: 1>}, {transform_indices = @transform_3, window_bounds = array<i64: 1, 4, 2>}]} {
    %c0 = arith.constant 0 : index
    %c0_0 = arith.constant 0 : index
    %0 = vector.load %arg2[%c0, %c0_0] : memref<4x128xf32, #tpu.memory_space<vmem>>, vector<4x128xf32>
    %c0_1 = arith.constant 0 : index
    %c0_2 = arith.constant 0 : index
    %1 = vector.load %arg1[%c0_1, %c0_2] : memref<2x128xf32, #tpu.memory_space<vmem>>, vector<2x128xf32>
    %cst = arith.constant dense<0.000000e+00> : vector<4x2xf32>
    %2 = tpu.matmul %0, %1, %cst {dimension_numbers = #tpu.dot_dimension_numbers<[1], [1], [0], [0], [0, 0, 1, 0], [], []>} : vector<4x128xf32>, vector<2x128xf32>, vector<4x2xf32> -> vector<4x2xf32>
    %c0_3 = arith.constant 0 : index
    %3 = memref.load %arg3[%c0_3] : memref<1xf32, #tpu.memory_space<smem>>
    %4 = vector.broadcast %3 : f32 to vector<4x2xf32>
    %5 = arith.addf %2, %4 : vector<4x2xf32>
    %6 = vector.shape_cast %5 : vector<4x2xf32> to vector<1x4x2xf32>
    %c0_4 = arith.constant 0 : index
    %c0_5 = arith.constant 0 : index
    %c0_6 = arith.constant 0 : index
    %7 = vector.load %arg4[%c0_4, %c0_5, %c0_6] : memref<1x4x2xf32, #tpu.memory_space<vmem>>, vector<1x4x2xf32>
    tpu.vector_store %arg4[%c0_4, %c0_5, %c0_6], %6 {strides = array<i32>} : memref<1x4x2xf32, #tpu.memory_space<vmem>>, vector<1x4x2xf32>,
    return
  }
  func.func @transform_0(%arg0: i32) -> (i32, i32) {
    %c0_i32 = arith.constant 0 : i32
    %c0_i32_0 = arith.constant 0 : i32
    return %arg0, %c0_i32 : i32, i32
  }
  func.func @transform_1(%arg0: i32) -> (i32, i32) {
    %c0_i32 = arith.constant 0 : i32
    %c0_i32_0 = arith.constant 0 : i32
    %c0_i32_1 = arith.constant 0 : i32
    return %c0_i32, %c0_i32_0 : i32, i32
  }
  func.func @transform_2(%arg0: i32) -> i32 {
    %c0_i32 = arith.constant 0 : i32
    %c0_i32_0 = arith.constant 0 : i32
    return %c0_i32 : i32
  }
  func.func @transform_3(%arg0: i32) -> (i32, i32, i32) {
    %c0_i32 = arith.constant 0 : i32
    %c0_i32_0 = arith.constant 0 : i32
    %c0_i32_1 = arith.constant 0 : i32
    return %arg0, %c0_i32, %c0_i32_0 : i32, i32, i32
  }
}

</mosaic_0001>

<bundles_post_ra>
// kernel: linear_policy_forward.1
= control target key start
LH: loop header
LB: loop body
LE: loop exit
PB: predicated region body
PF: predicated region fallthrough
CT: control target
= control target key end

     0   :  { %vm39_vm0 = vcmask 11264   ;;  %s77_s0 = inlined_call_operand.vmem [shape: f32[2,128], index: 0, kind: input, shape index: {}]   ;;  %s78_s1 = inlined_call_operand.vmem [shape: f32[4,128], index: 1, kind: input, shape index: {}]   ;;  %s79_s2 = inlined_call_operand.<no memory space> [shape: f32[1], index: 2, kind: input, shape index: {}]   ;;  %s80_s3 = inlined_call_operand.vmem [shape: f32[1,4,2], index: 3, kind: output, shape index: {}]  }
   0x1   :  { %v16_v0 = vld [vmem:[%s77_s0] sm:$0x3]  ;;  %v18_v2 = vstv %s79_s2 }
   0x2   :  { %34 = vmatpush.xpose.msra.mxu0 %v16_v0  ;;  %v15_v1 = vld [vmem:[%s78_s1] sm:$0xf] }
   0x5   :  { %35 = vmatmul.f32.vlgmr.msra.gmra.mxu0 %v15_v1 }
  0x82   :  { %v36_v3 = vpop.f32.mrf.mxu0 }
  0x83   :  { %v37_v4 = vadd.f32 %v36_v3, %v18_v2 }
  0x85   :  { %40 = vst.msk [vmem:[%s80_s3] sm:$0xf] %vm39_vm0, %v37_v4 }

</bundles_post_ra>
